<compile_context>
chip_gen: v7x
topology: tpu7x:2x2x1
jax: 0.10.0
libtpu: 0.0.40
codegen_flags: <defaults>
</compile_context>

<pallas_src>
import jax
import jax.numpy as jnp
from jax.experimental import pallas as pl
from jax.experimental.pallas import tpu as pltpu

GAMMA = 1.5
ALPHA = 0.25

LANE_W = 128          # lane width of the 2-D slab (vreg lane count)
BLOCK_ROWS = 4096     # rows per tile -> 4096*128*4B = 2 MiB f32 tiles
SLAB = 8 * LANE_W     # 1024: element granularity of the zero-copy fast path


def _round_up(x, m):
    return ((x + m - 1) // m) * m


def _num_tensorcores():
    """2 on megacore chips (v4 / v5p / v7x), else 1 (v2/v3/v5e/v6e, unknown)."""
    try:
        kind = jax.devices()[0].device_kind.lower()
    except Exception:
        return 1
    if any(tag in kind for tag in ("v4", "v5p", "v7")):
        return 2
    return 1


def _make_kernel(gamma, alpha, n_valid, block_rows, n_blocks, n_steps):
    # Static masking constants (all shapes are static at trace time).
    covered = n_blocks * block_rows * LANE_W   # elements the buffers cover
    needs_mask = n_valid < covered             # partial final block / padded tail
    full_rows = n_valid // LANE_W              # rows that are fully valid
    tail_lanes = n_valid % LANE_W              # valid lanes in row `full_rows`

    def kernel(pred_ref, true_ref, out_ref, acc_ref):
        c = pl.program_id(0)
        i = pl.program_id(1)

        @pl.when(i == 0)
        def _():
            acc_ref[...] = jnp.zeros_like(acc_ref)

        blk = c * n_steps + i           # logical (un-clamped) block index

        @pl.when(blk < n_blocks)        # skip the (rare) overshoot steps
        def _():
            x = pred_ref[...].astype(jnp.float32)   # logits
            z = true_ref[...].astype(jnp.float32)   # targets

            # One exp per element, reused by BCE and the sigmoid.
            e = jnp.exp(-jnp.abs(x))

            # BCEWithLogits (reduction='none'), numerically stable form:
            #   max(x, 0) - x*z + log(1 + exp(-|x|))
            bce = jnp.maximum(x, 0.0) - x * z + jnp.log1p(e)

            # sigmoid(x) from the same e:  x>=0 -> 1/(1+e),  x<0 -> e/(1+e).
            inv = pl.reciprocal(1.0 + e, approx=True)
            pred_prob = jnp.where(x >= 0.0, inv, e * inv)

            p_t = z * pred_prob + (1.0 - z) * (1.0 - pred_prob)
            alpha_factor = z * alpha + (1.0 - z) * (1.0 - alpha)
            t = 1.0 - p_t
            if gamma == 1.5:
                # t**1.5 = t*t*rsqrt(t); guard t==0 (rsqrt(0)=inf -> 0*inf).
                mf = jnp.where(t > 0.0, t * t * jax.lax.rsqrt(t), 0.0)
            elif gamma == 0.0:
                mf = jnp.ones_like(t)
            else:
                mf = jnp.power(t, gamma)

            loss = bce * alpha_factor * mf

            if needs_mask:
                # Zero contributions from (a) buffer rows past the array in a
                # partial final block and (b) padded tail elements.
                row = blk * block_rows + jax.lax.broadcasted_iota(
                    jnp.int32, (block_rows, LANE_W), 0)
                if tail_lanes == 0:
                    valid = row < full_rows
                else:
                    lane = jax.lax.broadcasted_iota(
                        jnp.int32, (block_rows, LANE_W), 1)
                    valid = (row < full_rows) | (
                        (row == full_rows) & (lane < tail_lanes))
                loss = jnp.where(valid, loss, 0.0)

            # Layout-preserving fold onto the (8, 128) accumulator:
            # pure inter-vreg VPU adds, no XLU, no full-tile acc RMW.
            acc_ref[...] += jnp.sum(
                loss.reshape(block_rows // 8, 8, LANE_W), axis=0)

        @pl.when(i == pl.num_programs(1) - 1)
        def _():
            out_ref[...] = acc_ref[...]

    return kernel


def focal_loss(pred, true, gamma=GAMMA, alpha=ALPHA, reduction="mean"):
    """YOLOv7 FocalLoss over BCE-with-logits; 'mean' (default) or 'sum'."""
    # TODO(synk): reduction='none' (elementwise loss output) is not implemented.
    assert pred.shape == true.shape
    n_valid = pred.size

    flat_p = pred.reshape(-1)
    flat_t = true.reshape(-1)

    if n_valid % SLAB != 0:
        # Fallback (uncommon): pad up to a 1024-element multiple.  This copies
        # the inputs once; the padded tail is masked in-kernel, so the pad
        # value does not matter.
        pad = _round_up(n_valid, SLAB) - n_valid
        flat_p = jnp.pad(flat_p, (0, pad))
        flat_t = jnp.pad(flat_t, (0, pad))

    rows = flat_p.size // LANE_W            # multiple of 8
    p2 = flat_p.reshape(rows, LANE_W)       # free reshape (no copy)
    t2 = flat_t.reshape(rows, LANE_W)

    block_rows = min(BLOCK_ROWS, rows)      # multiple of 8
    n_blocks = pl.cdiv(rows, block_rows)
    ncores = max(1, min(_num_tensorcores(), n_blocks))
    n_steps = pl.cdiv(n_blocks, ncores)

    kernel = _make_kernel(float(gamma), float(alpha), n_valid,
                          block_rows, n_blocks, n_steps)

    def in_map(c, i):
        # Contiguous block range per core; clamp so a (rare) overshoot step
        # never DMAs out of bounds -- the kernel skips it via `blk < n_blocks`.
        return (jnp.minimum(c * n_steps + i, n_blocks - 1), 0)

    partials = pl.pallas_call(
        kernel,
        out_shape=jax.ShapeDtypeStruct((ncores * 8, LANE_W), jnp.float32),
        grid_spec=pltpu.PrefetchScalarGridSpec(
            num_scalar_prefetch=0,
            grid=(ncores, n_steps),
            in_specs=[
                pl.BlockSpec((block_rows, LANE_W), in_map),
                pl.BlockSpec((block_rows, LANE_W), in_map),
            ],
            out_specs=pl.BlockSpec((8, LANE_W), lambda c, i: (c, 0)),
            scratch_shapes=[pltpu.VMEM((8, LANE_W), jnp.float32)],
        ),
        compiler_params=pltpu.CompilerParams(
            dimension_semantics=("parallel", "arbitrary"),
        ),
    )(p2, t2)

    total = jnp.sum(partials)
    if reduction == "mean":
        return total / n_valid
    return total  # 'sum'


def _focal_loss_ref(pred, true, gamma=GAMMA, alpha=ALPHA):
    x = pred.astype(jnp.float32)
    z = true.astype(jnp.float32)
    bce = jnp.maximum(x, 0.0) - x * z + jnp.log1p(jnp.exp(-jnp.abs(x)))
    p = jax.nn.sigmoid(x)
    p_t = z * p + (1 - z) * (1 - p)
    af = z * alpha + (1 - z) * (1 - alpha)
    mf = jnp.power(1.0 - p_t, gamma)
    return jnp.mean(bce * af * mf)


if __name__ == "__main__":
    key = jax.random.PRNGKey(0)
    k1, k2, k3, k4 = jax.random.split(key, 4)

    # Detection-head style logits / targets (numel % 1024 == 0 -> zero-copy path).
    shape = (2, 4, 16, 16)
    pred = jax.random.normal(k1, shape, dtype=jnp.float32) * 2.0
    true = (jax.random.uniform(k2, shape) > 0.7).astype(jnp.float32)

    out = jax.block_until_ready(focal_loss(pred, true))
    ref = _focal_loss_ref(pred, true)
    # rtol loosened to cover the approx-reciprocal sigmoid (~2^-12 rel err).
    assert jnp.allclose(out, ref, rtol=5e-3, atol=1e-5), (out, ref)

    # Ragged size (numel % 1024 != 0) exercising the padded + masked path.
    shape2 = (3, 5, 7, 11)
    pred2 = jax.random.normal(k3, shape2, dtype=jnp.float32) * 2.0
    true2 = (jax.random.uniform(k4, shape2) > 0.7).astype(jnp.float32)

    out2 = jax.block_until_ready(focal_loss(pred2, true2))
    ref2 = _focal_loss_ref(pred2, true2)
    assert jnp.allclose(out2, ref2, rtol=5e-3, atol=1e-5), (out2, ref2)

    print("KERNEL_OK")
</pallas_src>

<mosaic_0001>
module attributes {stable_mosaic.version = 11 : i64} {
  func.func @kernel(%arg0: i32, %arg1: i32, %arg2: memref<16x128xf32, #tpu.memory_space<vmem>>, %arg3: memref<16x128xf32, #tpu.memory_space<vmem>>, %arg4: memref<8x128xf32, #tpu.memory_space<vmem>>, %arg5: memref<8x128xf32, #tpu.memory_space<vmem>>) attributes {dimension_semantics = [#tpu.dimension_semantics<parallel>, #tpu.dimension_semantics<arbitrary>], iteration_bounds = array<i64: 1, 1>, scalar_prefetch = 0 : i64, scratch_operands = 1 : i64, tpu.core_type = #tpu.core_type<tc>, window_params = [{transform_indices = @transform_0, window_bounds = array<i64: 16, 128>}, {transform_indices = @transform_1, window_bounds = array<i64: 16, 128>}, {transform_indices = @transform_2, window_bounds = array<i64: 8, 128>}]} {
    %c0_i32 = arith.constant 0 : i32
    %0 = arith.cmpi eq, %arg1, %c0_i32 : i32
    %1 = arith.extui %0 : i1 to i32
    %c0_i32_0 = arith.constant 0 : i32
    %2 = arith.cmpi ne, %1, %c0_i32_0 : i32
    scf.if %2 {
      %cst = arith.constant 0.000000e+00 : f32
      %11 = vector.broadcast %cst : f32 to vector<8x128xf32>
      %c0 = arith.constant 0 : index
      %c0_5 = arith.constant 0 : index
      %12 = vector.load %arg5[%c0, %c0_5] : memref<8x128xf32, #tpu.memory_space<vmem>>, vector<8x128xf32>
      tpu.vector_store %arg5[%c0, %c0_5], %11 {strides = array<i32>} : memref<8x128xf32, #tpu.memory_space<vmem>>, vector<8x128xf32>,
    } else {
    }
    %c1_i32 = arith.constant 1 : i32
    %3 = arith.muli %arg0, %c1_i32 : i32
    %4 = arith.addi %3, %arg1 : i32
    %c1_i32_1 = arith.constant 1 : i32
    %5 = arith.cmpi slt, %4, %c1_i32_1 : i32
    %6 = arith.extui %5 : i1 to i32
    %c0_i32_2 = arith.constant 0 : i32
    %7 = arith.cmpi ne, %6, %c0_i32_2 : i32
    scf.if %7 {
      %c0 = arith.constant 0 : index
      %c0_5 = arith.constant 0 : index
      %11 = vector.load %arg2[%c0, %c0_5] : memref<16x128xf32, #tpu.memory_space<vmem>>, vector<16x128xf32>
      %c0_6 = arith.constant 0 : index
      %c0_7 = arith.constant 0 : index
      %12 = vector.load %arg3[%c0_6, %c0_7] : memref<16x128xf32, #tpu.memory_space<vmem>>, vector<16x128xf32>
      %13 = math.absf %11 : vector<16x128xf32>
      %cst = arith.constant 0.000000e+00 : f32
      %14 = vector.broadcast %cst : f32 to vector<16x128xf32>
      %15 = arith.subf %14, %13 : vector<16x128xf32>
      %16 = math.exp %15 : vector<16x128xf32>
      %cst_8 = arith.constant 0.000000e+00 : f32
      %17 = vector.broadcast %cst_8 : f32 to vector<16x128xf32>
      %18 = arith.maximumf %11, %17 : vector<16x128xf32>
      %19 = arith.mulf %11, %12 : vector<16x128xf32>
      %20 = arith.subf %18, %19 : vector<16x128xf32>
      %21 = math.log1p %16 : vector<16x128xf32>
      %22 = arith.addf %20, %21 : vector<16x128xf32>
      %cst_9 = arith.constant 1.000000e+00 : f32
      %23 = vector.broadcast %cst_9 : f32 to vector<16x128xf32>
      %24 = arith.addf %23, %16 : vector<16x128xf32>
      %25 = tpu.reciprocal %24 {approx = true} : vector<16x128xf32> -> vector<16x128xf32>
      %cst_10 = arith.constant 0.000000e+00 : f32
      %26 = vector.broadcast %cst_10 : f32 to vector<16x128xf32>
      %27 = arith.cmpf oge, %11, %26 : vector<16x128xf32>
      %28 = arith.mulf %16, %25 : vector<16x128xf32>
      %29 = arith.select %27, %25, %28 : vector<16x128xi1>, vector<16x128xf32>
      %30 = arith.mulf %12, %29 : vector<16x128xf32>
      %cst_11 = arith.constant 1.000000e+00 : f32
      %31 = vector.broadcast %cst_11 : f32 to vector<16x128xf32>
      %32 = arith.subf %31, %12 : vector<16x128xf32>
      %cst_12 = arith.constant 1.000000e+00 : f32
      %33 = vector.broadcast %cst_12 : f32 to vector<16x128xf32>
      %34 = arith.subf %33, %29 : vector<16x128xf32>
      %35 = arith.mulf %32, %34 : vector<16x128xf32>
      %36 = arith.addf %30, %35 : vector<16x128xf32>
      %cst_13 = arith.constant 2.500000e-01 : f32
      %37 = vector.broadcast %cst_13 : f32 to vector<16x128xf32>
      %38 = arith.mulf %12, %37 : vector<16x128xf32>
      %cst_14 = arith.constant 1.000000e+00 : f32
      %39 = vector.broadcast %cst_14 : f32 to vector<16x128xf32>
      %40 = arith.subf %39, %12 : vector<16x128xf32>
      %cst_15 = arith.constant 7.500000e-01 : f32
      %41 = vector.broadcast %cst_15 : f32 to vector<16x128xf32>
      %42 = arith.mulf %40, %41 : vector<16x128xf32>
      %43 = arith.addf %38, %42 : vector<16x128xf32>
      %cst_16 = arith.constant 1.000000e+00 : f32
      %44 = vector.broadcast %cst_16 : f32 to vector<16x128xf32>
      %45 = arith.subf %44, %36 : vector<16x128xf32>
      %cst_17 = arith.constant 0.000000e+00 : f32
      %46 = vector.broadcast %cst_17 : f32 to vector<16x128xf32>
      %47 = arith.cmpf ogt, %45, %46 : vector<16x128xf32>
      %48 = arith.mulf %45, %45 : vector<16x128xf32>
      %49 = math.rsqrt %45 : vector<16x128xf32>
      %50 = arith.mulf %48, %49 : vector<16x128xf32>
      %cst_18 = arith.constant 0.000000e+00 : f32
      %51 = vector.broadcast %cst_18 : f32 to vector<16x128xf32>
      %52 = arith.select %47, %50, %51 : vector<16x128xi1>, vector<16x128xf32>
      %53 = arith.mulf %22, %43 : vector<16x128xf32>
      %54 = arith.mulf %53, %52 : vector<16x128xf32>
      %c0_19 = arith.constant 0 : index
      %c0_20 = arith.constant 0 : index
      %55 = vector.load %arg5[%c0_19, %c0_20] : memref<8x128xf32, #tpu.memory_space<vmem>>, vector<8x128xf32>
      %56 = vector.shape_cast %54 : vector<16x128xf32> to vector<2x8x128xf32>
      %cst_21 = arith.constant dense<0.000000e+00> : vector<8x128xf32>
      %57 = vector.multi_reduction <add>, %56, %cst_21 [0] : vector<2x8x128xf32> to vector<8x128xf32>
      %58 = arith.addf %55, %57 : vector<8x128xf32>
      %c0_22 = arith.constant 0 : index
      %c0_23 = arith.constant 0 : index
      %59 = vector.load %arg5[%c0_22, %c0_23] : memref<8x128xf32, #tpu.memory_space<vmem>>, vector<8x128xf32>
      tpu.vector_store %arg5[%c0_22, %c0_23], %58 {strides = array<i32>} : memref<8x128xf32, #tpu.memory_space<vmem>>, vector<8x128xf32>,
    } else {
    }
    %c0_i32_3 = arith.constant 0 : i32
    %8 = arith.cmpi eq, %arg1, %c0_i32_3 : i32
    %9 = arith.extui %8 : i1 to i32
    %c0_i32_4 = arith.constant 0 : i32
    %10 = arith.cmpi ne, %9, %c0_i32_4 : i32
    scf.if %10 {
      %c0 = arith.constant 0 : index
      %c0_5 = arith.constant 0 : index
      %11 = vector.load %arg5[%c0, %c0_5] : memref<8x128xf32, #tpu.memory_space<vmem>>, vector<8x128xf32>
      %c0_6 = arith.constant 0 : index
      %c0_7 = arith.constant 0 : index
      %12 = vector.load %arg4[%c0_6, %c0_7] : memref<8x128xf32, #tpu.memory_space<vmem>>, vector<8x128xf32>
      tpu.vector_store %arg4[%c0_6, %c0_7], %11 {strides = array<i32>} : memref<8x128xf32, #tpu.memory_space<vmem>>, vector<8x128xf32>,
    } else {
    }
    return
  }
  func.func @transform_0(%arg0: i32, %arg1: i32) -> (i32, i32) {
    %c1_i32 = arith.constant 1 : i32
    %0 = arith.muli %arg0, %c1_i32 : i32
    %1 = arith.addi %0, %arg1 : i32
    %c0_i32 = arith.constant 0 : i32
    %2 = arith.minsi %1, %c0_i32 : i32
    %c0_i32_0 = arith.constant 0 : i32
    %c0_i32_1 = arith.constant 0 : i32
    return %2, %c0_i32_0 : i32, i32
  }
  func.func @transform_1(%arg0: i32, %arg1: i32) -> (i32, i32) {
    %c1_i32 = arith.constant 1 : i32
    %0 = arith.muli %arg0, %c1_i32 : i32
    %1 = arith.addi %0, %arg1 : i32
    %c0_i32 = arith.constant 0 : i32
    %2 = arith.minsi %1, %c0_i32 : i32
    %c0_i32_0 = arith.constant 0 : i32
    %c0_i32_1 = arith.constant 0 : i32
    return %2, %c0_i32_0 : i32, i32
  }
  func.func @transform_2(%arg0: i32, %arg1: i32) -> (i32, i32) {
    %c0_i32 = arith.constant 0 : i32
    %c0_i32_0 = arith.constant 0 : i32
    return %arg0, %c0_i32 : i32, i32
  }
}

</mosaic_0001>

<bundles_post_ra>
// kernel: tpu_custom_call.1
= control target key start
LH: loop header
LB: loop body
LE: loop exit
PB: predicated region body
PF: predicated region fallthrough
CT: control target
= control target key end

     0   :  { %7 = vsyncpa [#allocation4], 0  ;;  %s334_s0 = inlined_call_operand.hbm [shape: f32[16,128], index: 0, kind: input, shape index: {}]   ;;  %s335_s1 = inlined_call_operand.hbm [shape: f32[16,128], index: 1, kind: input, shape index: {}]   ;;  %s336_s2 = inlined_call_operand.hbm [shape: f32[8,128], index: 2, kind: output, shape index: {}]  }
   0x1   :  { %8 = vsyncpa [#allocation7], 0 }
   0x2   :  { %9 = vsyncpa [#allocation5], 0  ;;  %s272_s9 = smov [#allocation3]   ;;  %s200_s13 = scalar_lea.hbm %s334_s0, 256 }
   0x3   :  { %s21_s10 = sshll.u32 %s272_s9, 4  ;;  %p201_p0 = scmp.ne.s32.totalorder %s334_s0, %s200_s13  ;;  %s22_s10 = int_to_ptr.vmem [resolvable:$true] %s21_s10 }
   0x4   :  { %p204_p1 = scmp.lt.u32.totalorder %s200_s13, %s334_s0 }
   0x6   :  { %p206_p2 = pnand %p204_p1, %p201_p0 }
   0x8   :  { %209 = shalt.err (!%p206_p2)
}
   0x9   :  { %s210_s18 = scalar_lea.vmem %s22_s10, 256  ;;  %p215_p4 = scmp.lt.s32.totalorder %s22_s10, %s22_s10 }
   0xa   :  { %p211_p3 = scmp.ne.s32.totalorder %s22_s10, %s210_s18  ;;  %p216_p5 = scmp.lt.s32.totalorder %s210_s18, %s210_s18 }
   0xc   :  { %p217_p6 = por %p216_p5, %p215_p4 }
   0xe   :  { %p218_p7 = pnand %p217_p6, %p211_p3 }
  0x10   :  { %221 = shalt.err (!%p218_p7)
}
  0x11   :  { %s273_s19 = smov 128   ;;  %s274_s20 = smov 8  }
  0x12   :  { %27 = dma.hbm_to_vmem [thread:$0]  %s334_s0, 256, %s22_s10, [#allocation4], %s273_s19, %s273_s19, %s274_s20  }
  0x13   :  { %s275_s23 = smov [#allocation6]   ;;  %s222_s27 = scalar_lea.hbm %s335_s1, 256 }
  0x14   :  { %s39_s24 = sshll.u32 %s275_s23, 4  ;;  %p223_p8 = scmp.ne.s32.totalorder %s335_s1, %s222_s27  ;;  %s40_s24 = int_to_ptr.vmem [resolvable:$true] %s39_s24 }
  0x15   :  { %p226_p9 = scmp.lt.u32.totalorder %s222_s27, %s335_s1 }
  0x17   :  { %p228_p10 = pnand %p226_p9, %p223_p8 }
  0x19   :  { %231 = shalt.err (!%p228_p10)
}
  0x1a   :  { %s232_s4 = scalar_lea.vmem %s40_s24, 256  ;;  %p237_p12 = scmp.lt.s32.totalorder %s40_s24, %s40_s24 }
  0x1b   :  { %p233_p11 = scmp.ne.s32.totalorder %s40_s24, %s232_s4  ;;  %p238_p13 = scmp.lt.s32.totalorder %s232_s4, %s232_s4 }
  0x1d   :  { %p239_p0 = por %p238_p13, %p237_p12 }
  0x1f   :  { %p240_p1 = pnand %p239_p0, %p233_p11 }
  0x21   :  { %243 = shalt.err (!%p240_p1)
}
  0x22   :  { %45 = dma.hbm_to_vmem [thread:$0]  %s335_s1, 256, %s40_s24, [#allocation7], %s273_s19, %s273_s19, %s274_s20  }
  0x23   :  { %266 = dma.done.wait [#allocation4], 256  }
  0x24   :  { %267 = vsyncadd [#allocation4], 4294967040 }
  0x25   :  { %268 = dma.done.wait [#allocation7], 256  }
  0x26   :  { %269 = vsyncadd [#allocation7], 4294967040  ;;  %v70_v0 = vld [vmem:[#allocation3] sm:$0xff]  ;;  %v316_v1 = vld [vmem:[#allocation3 + $0x8] sm:$0xff]  ;;  %s276_s1 = smov [#allocation8]  }
  0x27   :  { %v74_v2 = vand.u32 2147483647, %v70_v0  ;;  %v75_v3 = vand.u32 2147483647, %v316_v1  ;;  %v72_v12 = vld [vmem:[#allocation6] sm:$0xff]  ;;  %v73_v14 = vld [vmem:[#allocation6 + $0x8] sm:$0xff] }
  0x28   :  { %vm112_vm0 = vcmp.ge.f32.partialorder %v70_v0, 0.0  ;;  %vm113_vm1 = vcmp.ge.f32.partialorder %v316_v1, 0.0  ;;  %v120_v18 = vsub.f32 1.0, %v72_v12  ;;  %v121_v21 = vsub.f32 1.0, %v73_v14  ;;  %s165_s6 = sshll.u32 %s276_s1, 4  ;;  %s166_s6 = int_to_ptr.vmem [resolvable:$true] %s165_s6 }
  0x29   :  { %v76_v4 = vsub.f32 0.0, %v74_v2  ;;  %v77_v5 = vsub.f32 0.0, %v75_v3  ;;  %v82_v38 = vmax.f32 %v70_v0, 0.0  ;;  %v83_v39 = vmax.f32 %v316_v1, 0.0  ;;  %s244_s7 = scalar_lea.vmem %s166_s6, 128  ;;  %p249_p3 = scmp.lt.s32.totalorder %s166_s6, %s166_s6 }
  0x2a   :  { %v84_v40 = vmul.f32 %v72_v12, %v70_v0  ;;  %v85_v42 = vmul.f32 %v73_v14, %v316_v1  ;;  %v128_v49 = vmul.f32 0.25, %v72_v12  ;;  %v130_v50 = vmul.f32 0.75, %v120_v18  ;;  %p245_p2 = scmp.ne.s32.totalorder %s166_s6, %s244_s7  ;;  %p250_p4 = scmp.lt.s32.totalorder %s244_s7, %s244_s7 }
  0x2b   :  { %v78_v6 = vmul.f32 1.442695, %v76_v4  ;;  %v80_v7 = vmul.f32 1.442695, %v77_v5  ;;  %v129_v53 = vmul.f32 0.25, %v73_v14  ;;  %v131_v54 = vmul.f32 0.75, %v121_v21 }
  0x2c   :  { %v86_v48 = vsub.f32 %v82_v38, %v84_v40  ;;  %v87_v51 = vsub.f32 %v83_v39, %v85_v42  ;;  %v132_v57 = vadd.f32 %v130_v50, %v128_v49  ;;  %p251_p5 = por %p250_p4, %p249_p3 }
  0x2d   :  { %184 = vpow2.f32 %v78_v6  ;;  %v133_v59 = vadd.f32 %v131_v54, %v129_v53 }
  0x2e   :  { %186 = vpow2.f32 %v80_v7  ;;  %p252_p6 = pnand %p251_p5, %p245_p2 }
  0x37   :  { %v185_v8 = vpop.eup %184 }
  0x38   :  { %v187_v9 = vpop.eup %186  ;;  %v88_v10 = vadd.f32 1.0, %v185_v8  ;;  %v91_v19 = vmul.f32 -0.5, %v185_v8  ;;  %v94_v32 = vand.u32 2147483647, %v185_v8 }
  0x39   :  { %v97_v11 = vadd.f32 1.0, %v187_v9  ;;  %v100_v22 = vmul.f32 -0.5, %v187_v9  ;;  %v103_v36 = vand.u32 2147483647, %v187_v9 }
  0x3a   :  { %188 = vrcp.f32 %v88_v10  ;;  %v92_v29 = vadd.f32 1.0, %v91_v19  ;;  %vm95_vm2 = vcmp.lt.f32.partialorder %v94_v32, 0.0004427343 }
  0x3b   :  { %190 = vrcp.f32 %v97_v11  ;;  %v101_v33 = vadd.f32 1.0, %v100_v22  ;;  %vm104_vm3 = vcmp.lt.f32.partialorder %v103_v36, 0.0004427343 }
  0x3c   :  { %192 = vlog2.f32 %v88_v10  ;;  %v93_v44 = vmul.f32 %v185_v8, %v92_v29 }
  0x3d   :  { %194 = vlog2.f32 %v97_v11  ;;  %v102_v47 = vmul.f32 %v187_v9, %v101_v33 }
  0x44   :  { %v189_v13 = vpop.eup %188 }
  0x45   :  { %v191_v15 = vpop.eup %190  ;;  %v114_v16 = vmul.f32 %v189_v13, %v185_v8 }
  0x46   :  { %v115_v17 = vmul.f32 %v191_v15, %v187_v9  ;;  %v193_v31 = vpop.eup %192 }
  0x47   :  { %v116_v20 = vsel %vm112_vm0, %v189_v13, %v114_v16  ;;  %v195_v35 = vpop.eup %194  ;;  %v90_v43 = vmul.f32 0.6931472, %v193_v31 }
  0x48   :  { %v117_v23 = vsel %vm113_vm1, %v191_v15, %v115_v17  ;;  %v118_v24 = vmul.f32 %v116_v20, %v72_v12  ;;  %v122_v25 = vsub.f32 1.0, %v116_v20  ;;  %v99_v46 = vmul.f32 0.6931472, %v195_v35 }
  0x49   :  { %v119_v26 = vmul.f32 %v117_v23, %v73_v14  ;;  %v123_v27 = vsub.f32 1.0, %v117_v23  ;;  %v96_v52 = vsel %vm95_vm2, %v93_v44, %v90_v43 }
  0x4a   :  { %v124_v28 = vmul.f32 %v122_v25, %v120_v18  ;;  %v105_v55 = vsel %vm104_vm3, %v102_v47, %v99_v46  ;;  %v106_v56 = vadd.f32 %v96_v52, %v86_v48 }
  0x4b   :  { %v125_v30 = vmul.f32 %v123_v27, %v121_v21  ;;  %v107_v58 = vadd.f32 %v105_v55, %v87_v51 }
  0x4c   :  { %v126_v34 = vadd.f32 %v124_v28, %v118_v24  ;;  %v146_v63 = vmul.f32 %v132_v57, %v106_v56 }
  0x4d   :  { %v127_v37 = vadd.f32 %v125_v30, %v119_v26  ;;  %v147_v2 = vmul.f32 %v133_v59, %v107_v58 }
  0x4e   :  { %v134_v41 = vsub.f32 1.0, %v126_v34 }
  0x4f   :  { %v135_v45 = vsub.f32 1.0, %v127_v37 }
  0x50   :  { %196 = vrsqrt.f32 %v134_v41  ;;  %v138_v60 = vmul.f32 %v134_v41, %v134_v41  ;;  %vm136_vm4 = vcmp.gt.f32.partialorder %v134_v41, 0.0 }
  0x51   :  { %198 = vrsqrt.f32 %v135_v45  ;;  %v139_v61 = vmul.f32 %v135_v45, %v135_v45  ;;  %vm137_vm5 = vcmp.gt.f32.partialorder %v135_v45, 0.0 }
  0x5a   :  { %v197_v62 = vpop.eup %196 }
  0x5b   :  { %v199_v0 = vpop.eup %198  ;;  %v142_v1 = vmul.f32 %v197_v62, %v138_v60 }
  0x5c   :  { %v143_v3 = vmul.f32 %v199_v0, %v139_v61 }
  0x5d   :  { %v144_v4 = vsel %vm136_vm4, %v142_v1, 0.0 }
  0x5e   :  { %v145_v5 = vsel %vm137_vm5, %v143_v3, 0.0  ;;  %v148_v6 = vmul.f32 %v146_v63, %v144_v4 }
  0x5f   :  { %v149_v7 = vmul.f32 %v147_v2, %v145_v5 }
  0x61   :  { %v151_v8 = vadd.f32 %v149_v7, %v148_v6 }
  0x63   :  { %158 = vst [vmem:[#allocation8] sm:$0xff] %v151_v8 }
  0x64   :  { %255 = shalt.err (!%p252_p6)
}
  0x65   :  { %s256_s10 = scalar_lea.hbm %s336_s2, 128 }
  0x66   :  { %p257_p7 = scmp.ne.s32.totalorder %s336_s2, %s256_s10  ;;  %p260_p8 = scmp.lt.u32.totalorder %s256_s10, %s336_s2 }
  0x68   :  { %p262_p9 = pnand %p260_p8, %p257_p7 }
  0x6a   :  { %265 = shalt.err (!%p262_p9)
}
  0x6b   :  { %168 = dma.vmem_to_hbm [thread:$0]  %s166_s6, 128, %s336_s2, [#allocation5]  }
  0x6c   :  { %270 = dma.done.wait [#allocation5], 128  }
  0x6d   :  { %271 = vsyncadd [#allocation5], 4294967168 }
  0x6e   :  { %172 = vsyncpa [#allocation4], 1 }
  0x6f   :  { %173 = vsyncpa [#allocation7], 1 }
  0x70   :  { %174 = vsyncpa [#allocation5], 1 }

</bundles_post_ra>
